<compile_context>
chip_gen: v6e
topology: v6e:2x2x1
jax: 0.10.0
libtpu: 0.0.40
codegen_flags: <defaults>
</compile_context>

<pallas_src>
import functools

import jax
import jax.numpy as jnp
from jax import lax
from jax.experimental import pallas as pl
from jax.experimental.pallas import tpu as pltpu

EPS = 1e-5  # InstanceNorm2d default eps


# ----------------------------------------------------------------------------
# Pallas kernel: one fused (conv||gate) matmul -> per-sample IN -> sigmoid gate
#   patches_ref : (K, b_blk*P_pad)        bf16
#   w_ref       : (2*C_out, K)            bf16   (conv rows on top, gate below)
#   out_ref     : (C_out, b_blk*P_pad)    f32    (lane-dense)
#   y_scr       : (2*C_out, b_blk*P_pad)  f32    VMEM scratch (matmul result)
# ----------------------------------------------------------------------------
def gated_block_in_kernel(patches_ref, w_ref, out_ref, y_scr, *,
                          b_blk, c_out, p_pad, inv_p):
    # ONE MXU matmul covering all b_blk samples and both branches.
    y_scr[...] = jnp.dot(w_ref[...], patches_ref[...],
                         preferred_element_type=jnp.float32)

    def per_sample(i, carry):
        off = pl.multiple_of(i * p_pad, 128)
        yi = y_scr[:, pl.ds(off, p_pad)]                  # (2*C_out, P_pad) f32
        # One-pass InstanceNorm (affine=False).  Padded lanes are exactly zero
        # (zero patch columns => zero matmul output), so they contribute
        # nothing to s/ss; inv_p is 1/true_P.
        s = jnp.sum(yi, axis=-1, keepdims=True)
        ss = jnp.sum(yi * yi, axis=-1, keepdims=True)
        m = s * inv_p
        var = jnp.maximum(ss * inv_p - m * m, 0.0)         # guard cancellation
        yn = (yi - m) * lax.rsqrt(var + EPS)
        x1 = yn[:c_out, :]                                 # conv branch
        x2 = yn[c_out:, :]                                 # gate branch
        out_ref[:, pl.ds(off, p_pad)] = (
            x1 * jax.nn.sigmoid(x2)).astype(out_ref.dtype)
        return carry

    lax.fori_loop(0, b_blk, per_sample, 0, unroll=(b_blk <= 8))


# ----------------------------------------------------------------------------
# Glue: im2col in K-major, lane-dense layout (plain JAX; fuses in XLA).
# ----------------------------------------------------------------------------
def _round_up(x, m):
    return ((x + m - 1) // m) * m


def _im2col_k_major(x_nchw, kh, kw, stride, padding):
    """x: [N, C_in, H, W] -> patches [K, N, P], K = C_in*kh*kw (c_in-major,
    then kernel row, then kernel col — matches torch weight.reshape(C_out, K))."""
    n, c_in, h, w = x_nchw.shape
    xp = jnp.pad(x_nchw, ((0, 0), (0, 0), (padding, padding), (padding, padding)))
    h_out = (h + 2 * padding - kh) // stride + 1
    w_out = (w + 2 * padding - kw) // stride + 1
    cols = []
    for i in range(kh):
        for j in range(kw):
            cols.append(
                lax.slice(
                    xp,
                    (0, 0, i, j),
                    (n, c_in, i + (h_out - 1) * stride + 1,
                     j + (w_out - 1) * stride + 1),
                    (1, 1, stride, stride)))
    # [N, C_in, kh*kw, H_out, W_out] -> [C_in, kh*kw, N, H_out*W_out] -> [K, N, P]
    pat = jnp.stack(cols, axis=2)
    pat = jnp.transpose(pat, (1, 2, 0, 3, 4)).reshape(
        c_in * kh * kw, n, h_out * w_out)
    return pat, h_out, w_out


def _pick_batch_block(n, k_dim, p_pad, c_out, vmem_budget_bytes=20 * 1024 * 1024):
    """Samples per grid step, sized against a VMEM budget (double-buffered
    patches + double-buffered output + f32 matmul scratch).  Kept so the
    'parallel' grid axis has >= 2 steps when N >= 2 (v7x has 2 TensorCores)."""
    per_sample = (2 * k_dim * p_pad * 2        # patches block, x2 buffers, bf16
                  + 2 * c_out * p_pad * 4      # output block, x2 buffers, f32
                  + 2 * c_out * p_pad * 4)     # y scratch (2*C_out rows), f32
    b = max(1, vmem_budget_bytes // per_sample)
    b = min(b, 256, max(n, 1))
    if n >= 2:
        b = min(b, pl.cdiv(n, 2))              # keep >= 2 grid steps (megacore)
    return int(max(b, 1))


@functools.partial(jax.jit, static_argnames=("kernel_size", "stride", "padding"))
def gated_block_in(x_nchw, w_conv, b_conv, w_gate, b_gate, *,
                   kernel_size, stride, padding):
    """Forward pass of GatedBlockIN (deconv=False).  Returns NCHW f32 output.

    b_conv / b_gate are accepted for interface parity with the PyTorch module
    but are unused: InstanceNorm's mean subtraction cancels a per-channel bias
    exactly (only float-rounding-level difference).
    """
    del b_conv, b_gate
    n, c_in, h, w = x_nchw.shape
    c_out = w_conv.shape[0]
    kh = kw = kernel_size
    k_dim = c_in * kh * kw

    # TODO(synk): move im2col into the kernel (DMA raw [C_in,H,W] samples and
    # build the KxP contraction from shifted lane slices) to remove the kh*kw
    # HBM inflation of the patches array — biggest remaining win on v5e/v6e.
    # TODO(synk): deconv=True (ConvTranspose2d) path not implemented.
    patches, h_out, w_out = _im2col_k_major(x_nchw, kh, kw, stride, padding)
    p = h_out * w_out
    p_pad = _round_up(p, 128)                   # lane-dense, unmasked stores

    b_blk = _pick_batch_block(n, k_dim, p_pad, c_out)
    n_pad = _round_up(n, b_blk)                 # no b_blk | N requirement
    grid_b = n_pad // b_blk
    l_blk = b_blk * p_pad

    # Lane-dense 2-D patches [K, N_pad*P_pad]; zero-padded lanes/samples.
    patches = jnp.pad(patches, ((0, 0), (0, n_pad - n), (0, p_pad - p)))
    patches2d = patches.reshape(k_dim, n_pad * p_pad).astype(jnp.bfloat16)

    # Fused conv + gate weights: [2*C_out, K], bf16 MXU operand.
    w_both = jnp.concatenate(
        [w_conv.reshape(c_out, k_dim), w_gate.reshape(c_out, k_dim)], axis=0
    ).astype(jnp.bfloat16)

    kern = functools.partial(
        gated_block_in_kernel, b_blk=b_blk, c_out=c_out, p_pad=p_pad,
        inv_p=1.0 / p)

    cost = pl.CostEstimate(
        flops=2 * (2 * c_out) * k_dim * n_pad * p_pad,
        transcendentals=n_pad * c_out * p_pad,           # sigmoid exp
        bytes_accessed=(patches2d.size * 2 + w_both.size * 2
                        + c_out * n_pad * p_pad * 4),
    )

    out2d = pl.pallas_call(
        kern,
        out_shape=jax.ShapeDtypeStruct((c_out, n_pad * p_pad), jnp.float32),
        grid_spec=pltpu.PrefetchScalarGridSpec(
            num_scalar_prefetch=0,
            grid=(grid_b,),
            in_specs=[
                pl.BlockSpec((k_dim, l_blk), lambda b: (0, b)),      # patches
                pl.BlockSpec((2 * c_out, k_dim), lambda b: (0, 0)),  # fused W
            ],
            out_specs=pl.BlockSpec((c_out, l_blk), lambda b: (0, b)),
            scratch_shapes=[pltpu.VMEM((2 * c_out, l_blk), jnp.float32)],
        ),
        compiler_params=pltpu.CompilerParams(
            dimension_semantics=("parallel",),
            vmem_limit_bytes=32 * 1024 * 1024,
        ),
        cost_estimate=cost,
    )(patches2d, w_both)

    # (C_out, N_pad, P_pad) -> crop padding -> NCHW (one small XLA transpose).
    # TODO(synk): emit bf16 output (halves writeback) if the consumer allows.
    out = out2d.reshape(c_out, n_pad, p_pad)[:, :n, :p]
    return jnp.transpose(out, (1, 0, 2)).reshape(n, c_out, h_out, w_out)


# ----------------------------------------------------------------------------
# Reference (same math as the PyTorch module; matmul inputs in bf16 to match
# the kernel's MXU precision; biases included — they cancel under IN).
# ----------------------------------------------------------------------------
def _reference(x, w_conv, b_conv, w_gate, b_gate, stride, padding):
    dn = ("NCHW", "OIHW", "NCHW")
    xb = x.astype(jnp.bfloat16)

    def conv(wt, b):
        y = lax.conv_general_dilated(
            xb, wt.astype(jnp.bfloat16),
            window_strides=(stride, stride),
            padding=[(padding, padding), (padding, padding)],
            dimension_numbers=dn,
            preferred_element_type=jnp.float32)
        return y + b.reshape(1, -1, 1, 1)

    def inorm(y):
        m = jnp.mean(y, axis=(2, 3), keepdims=True)
        v = jnp.mean((y - m) ** 2, axis=(2, 3), keepdims=True)
        return (y - m) * lax.rsqrt(v + EPS)

    x1 = inorm(conv(w_conv, b_conv))
    x2 = jax.nn.sigmoid(inorm(conv(w_gate, b_gate)))
    return x1 * x2


if __name__ == "__main__":
    # Module config (deconv=False path): c_in=4, c_out=8, 3x3, stride 1, pad 1
    N, C_IN, H, W = 2, 4, 16, 16
    C_OUT, KSIZE, STRIDE, PAD = 8, 3, 1, 1

    key = jax.random.PRNGKey(0)
    kx, k1, k2, k3, k4 = jax.random.split(key, 5)

    x = jax.random.normal(kx, (N, C_IN, H, W), dtype=jnp.float32)

    # Deterministic synthetic parameters (PyTorch-like uniform(-bound, bound))
    fan_in = C_IN * KSIZE * KSIZE
    bound = 1.0 / (fan_in ** 0.5)
    w_conv = jax.random.uniform(k1, (C_OUT, C_IN, KSIZE, KSIZE), jnp.float32, -bound, bound)
    b_conv = jax.random.uniform(k2, (C_OUT,), jnp.float32, -bound, bound)
    w_gate = jax.random.uniform(k3, (C_OUT, C_IN, KSIZE, KSIZE), jnp.float32, -bound, bound)
    b_gate = jax.random.uniform(k4, (C_OUT,), jnp.float32, -bound, bound)

    out = gated_block_in(
        x, w_conv, b_conv, w_gate, b_gate,
        kernel_size=KSIZE, stride=STRIDE, padding=PAD)
    out = jax.block_until_ready(out)

    ref = _reference(x, w_conv, b_conv, w_gate, b_gate, STRIDE, PAD)
    assert out.shape == (N, C_OUT, H, W)
    max_err = float(jnp.max(jnp.abs(out - ref)))
    assert jnp.allclose(out, ref, atol=5e-3, rtol=5e-3), \
        f"mismatch vs reference (max err {max_err})"

    print("KERNEL_OK")
</pallas_src>

<mosaic_0001>
module attributes {stable_mosaic.version = 11 : i64} {
  func.func @gated_block_in_kernel(%arg0: i32, %arg1: memref<36x256xbf16, #tpu.memory_space<vmem>>, %arg2: memref<16x36xbf16, #tpu.memory_space<vmem>>, %arg3: memref<8x256xf32, #tpu.memory_space<vmem>>, %arg4: memref<16x256xf32, #tpu.memory_space<vmem>>) attributes {dimension_semantics = [#tpu.dimension_semantics<parallel>], iteration_bounds = array<i64: 2>, scalar_prefetch = 0 : i64, scratch_operands = 1 : i64, tpu.core_type = #tpu.core_type<tc>, window_params = [{transform_indices = @transform_0, window_bounds = array<i64: 36, 256>}, {pipeline_mode = #tpu.pipeline_mode<synchronous>, transform_indices = @transform_1, window_bounds = array<i64: 16, 36>}, {transform_indices = @transform_2, window_bounds = array<i64: 8, 256>}]} {
    %c0 = arith.constant 0 : index
    %c0_0 = arith.constant 0 : index
    %0 = vector.load %arg2[%c0, %c0_0] : memref<16x36xbf16, #tpu.memory_space<vmem>>, vector<16x36xbf16>
    %c0_1 = arith.constant 0 : index
    %c0_2 = arith.constant 0 : index
    %1 = vector.load %arg1[%c0_1, %c0_2] : memref<36x256xbf16, #tpu.memory_space<vmem>>, vector<36x256xbf16>
    %cst = arith.constant dense<0.000000e+00> : vector<16x256xf32>
    %2 = tpu.matmul %0, %1, %cst {dimension_numbers = #tpu.dot_dimension_numbers<[1], [0], [0], [1], [0, 0, 1, 1], [], []>} : vector<16x36xbf16>, vector<36x256xbf16>, vector<16x256xf32> -> vector<16x256xf32>
    %c0_3 = arith.constant 0 : index
    %c0_4 = arith.constant 0 : index
    %3 = vector.load %arg4[%c0_3, %c0_4] : memref<16x256xf32, #tpu.memory_space<vmem>>, vector<16x256xf32>
    tpu.vector_store %arg4[%c0_3, %c0_4], %2 {strides = array<i32>} : memref<16x256xf32, #tpu.memory_space<vmem>>, vector<16x256xf32>,
    %c0_i32 = arith.constant 0 : i32
    %c256_i32 = arith.constant 256 : i32
    %4 = arith.muli %c0_i32, %c256_i32 : i32
    %5 = tpu.assume_multiple %4, 128 : i32
    %c0_5 = arith.constant 0 : index
    %6 = arith.index_cast %5 : i32 to index
    %7 = vector.load %arg4[%c0_5, %6] : memref<16x256xf32, #tpu.memory_space<vmem>>, vector<16x256xf32>
    %cst_6 = arith.constant dense<0.000000e+00> : vector<16xf32>
    %8 = vector.multi_reduction <add>, %7, %cst_6 [1] : vector<16x256xf32> to vector<16xf32>
    %9 = vector.shape_cast %8 : vector<16xf32> to vector<16x1xf32>
    %10 = arith.mulf %7, %7 : vector<16x256xf32>
    %cst_7 = arith.constant dense<0.000000e+00> : vector<16xf32>
    %11 = vector.multi_reduction <add>, %10, %cst_7 [1] : vector<16x256xf32> to vector<16xf32>
    %12 = vector.shape_cast %11 : vector<16xf32> to vector<16x1xf32>
    %cst_8 = arith.constant 3.906250e-03 : f32
    %13 = vector.broadcast %cst_8 : f32 to vector<16x1xf32>
    %14 = arith.mulf %9, %13 : vector<16x1xf32>
    %cst_9 = arith.constant 3.906250e-03 : f32
    %15 = vector.broadcast %cst_9 : f32 to vector<16x1xf32>
    %16 = arith.mulf %12, %15 : vector<16x1xf32>
    %17 = arith.mulf %14, %14 : vector<16x1xf32>
    %18 = arith.subf %16, %17 : vector<16x1xf32>
    %cst_10 = arith.constant 0.000000e+00 : f32
    %19 = vector.broadcast %cst_10 : f32 to vector<16x1xf32>
    %20 = arith.maximumf %18, %19 : vector<16x1xf32>
    %21 = vector.broadcast %14 : vector<16x1xf32> to vector<16x256xf32>
    %22 = arith.subf %7, %21 : vector<16x256xf32>
    %cst_11 = arith.constant 9.99999974E-6 : f32
    %23 = vector.broadcast %cst_11 : f32 to vector<16x1xf32>
    %24 = arith.addf %20, %23 : vector<16x1xf32>
    %25 = math.rsqrt %24 : vector<16x1xf32>
    %26 = vector.broadcast %25 : vector<16x1xf32> to vector<16x256xf32>
    %27 = arith.mulf %22, %26 : vector<16x256xf32>
    %28 = vector.extract_strided_slice %27 {offsets = [0, 0], sizes = [8, 256], strides = [1, 1]} : vector<16x256xf32> to vector<8x256xf32>
    %29 = vector.extract_strided_slice %27 {offsets = [8, 0], sizes = [8, 256], strides = [1, 1]} : vector<16x256xf32> to vector<8x256xf32>
    %30 = arith.negf %29 : vector<8x256xf32>
    %31 = math.exp %30 : vector<8x256xf32>
    %cst_12 = arith.constant 1.000000e+00 : f32
    %32 = vector.broadcast %cst_12 : f32 to vector<8x256xf32>
    %33 = arith.addf %32, %31 : vector<8x256xf32>
    %34 = arith.divf %32, %33 : vector<8x256xf32>
    %35 = arith.mulf %28, %34 : vector<8x256xf32>
    %c0_13 = arith.constant 0 : index
    %36 = arith.index_cast %5 : i32 to index
    %37 = vector.load %arg3[%c0_13, %36] : memref<8x256xf32, #tpu.memory_space<vmem>>, vector<8x256xf32>
    tpu.vector_store %arg3[%c0_13, %36], %35 {strides = array<i32>} : memref<8x256xf32, #tpu.memory_space<vmem>>, vector<8x256xf32>,
    %c1_i32 = arith.constant 1 : i32
    return
  }
  func.func @transform_0(%arg0: i32) -> (i32, i32) {
    %c0_i32 = arith.constant 0 : i32
    %c0_i32_0 = arith.constant 0 : i32
    return %c0_i32, %arg0 : i32, i32
  }
  func.func @transform_1(%arg0: i32) -> (i32, i32) {
    %c0_i32 = arith.constant 0 : i32
    %c0_i32_0 = arith.constant 0 : i32
    %c0_i32_1 = arith.constant 0 : i32
    return %c0_i32, %c0_i32_0 : i32, i32
  }
  func.func @transform_2(%arg0: i32) -> (i32, i32) {
    %c0_i32 = arith.constant 0 : i32
    %c0_i32_0 = arith.constant 0 : i32
    return %c0_i32, %arg0 : i32, i32
  }
}

</mosaic_0001>

<bundles_post_ra>
// kernel: gated_block_in.1
= control target key start
LH: loop header
LB: loop body
LE: loop exit
PB: predicated region body
PF: predicated region fallthrough
CT: control target
= control target key end

     0   :  { %s525_s9 = smov 0   ;;  %s527_s10 = smov 0   ;;  %s580_s0 = inlined_call_operand.vmem [shape: bf16[36,512], index: 0, kind: input, shape index: {}]   ;;  %s581_s1 = inlined_call_operand.vmem [shape: bf16[16,36], index: 1, kind: input, shape index: {}]   ;;  %s582_s2 = inlined_call_operand.vmem [shape: f32[8,512], index: 2, kind: output, shape index: {}]  }
   0x1   :  { %s529_s11 = smov 0  }
   0x2 LB: > { %s414_s12 = sadd.s32 4294967295, %s507_s11   ;;  %s542_s13 = sadd.s32 1, %s507_s11   ;;  %s507_s11 = sphi %s529_s11, %s585_s11   ;;  %s503_s10 = sphi %s527_s10, %s584_s10   ;;  %s499_s9 = sphi %s525_s9, %s583_s9  }
   0x3   : > { %s16_s14 = ssub.s32 %s507_s11, %s542_s13  ;;  %s19_s15 = sadd.s32 1, %s503_s10 }
   0x4   : > { %p17_p0 = scmp.eq.s32.totalorder %s16_s14, 0  ;;  %p26_p1 = scmp.ne.s32.totalorder %s503_s10, %s499_s9 }
   0x5   : > { %p27_p2 = scmp.eq.s32.totalorder %s507_s11, 0  ;;  %p417_p4 = scmp.ge.s32.totalorder %s507_s11, 2 }
   0x6   : > { %s551_s16 = scalar_select %p17_p0, %s503_s10, %s19_s15  }
   0x7   : > { %p28_p3 = por %p27_p2, %p26_p1  ;;  %102 = sbr.rel (%p417_p4) target bundleno = 19 (0x13), region = 20 }
   0xc   : > { %105 = sbr.rel (!%p28_p3) target bundleno = 19 (0x13), region = 24  ;;  %s107_s17 = sand.u32 (%p28_p3), 1, %s503_s10  }
   0xd   : > { %s436_s18 = sshll.u32 (%p28_p3), %s507_s11, 3  ;;  %s437_s19 = smul.u32 (%p28_p3), 40, %s107_s17 }
   0xe   : > { %s112_s22 = scalar_lea.vmem (%p28_p3), %s580_s0, %s436_s18 }
   0xf   : > { %v149_v0 = vld [vmem:[%s112_s22] sm:$0xff] (%p28_p3)  ;;  %v151_v1 = vld [vmem:[%s112_s22 + $0x10] sm:$0xff] (%p28_p3)  ;;  %s109_s23 = scalar_lea.vmem (%p28_p3), [#allocation3], %s437_s19 }
  0x10   : > { %v153_v2 = vld [vmem:[%s112_s22 + $0x20] sm:$0xff] (%p28_p3)  ;;  %v155_v3 = vld [vmem:[%s112_s22 + $0x30] sm:$0xff] (%p28_p3)  ;;  %150 = vst [vmem:[%s109_s23] sm:$0xff] (%p28_p3), %v149_v0  ;;  %152 = vst [vmem:[%s109_s23 + $0x8] sm:$0xff] (%p28_p3), %v151_v1 }
  0x11   : > { %v157_v4 = vld [vmem:[%s112_s22 + $0x40] sm:$0xff]  ;;  %154 = vst [vmem:[%s109_s23 + $0x10] sm:$0xff] %v153_v2  ;;  %156 = vst [vmem:[%s109_s23 + $0x18] sm:$0xff] %v155_v3 }
  0x12   : > { %158 = vst [vmem:[%s109_s23 + $0x20] sm:$0xff] %v157_v4 }
  0x13 PF: > { %p420_p5 = scmp.ge.s32.totalorder %s507_s11, 1  ;;  %p163_p6 = scmp.lt.s32.totalorder %s507_s11, 3 }
  0x15   : > { %p164_p7 = pnand %p420_p5, %p163_p6 }
  0x16   : > { %s170_s24 = sand.u32 (!%p164_p7), 1, %s499_s9   ;;  %s421_s29 = sshll.u32 (!%p164_p7), %s414_s12, 1 }
  0x17   : > { %167 = sbr.rel (%p164_p7) target bundleno = 446 (0x1be), region = 62  ;;  %p193_p8 = scmp.lt.s32.totalorder (!%p164_p7), %s421_s29, 3 }
  0x18   : > { %s438_s25 = smul.u32 (!%p164_p7), 40, %s170_s24 }
  0x1a   : > { %s172_s26 = scalar_lea.vmem (!%p164_p7), [#allocation3], %s438_s25 }
  0x1c   : > { %v509_v5 = vmov 0   ;;  %v205_v6 = vld [vmem:[%s172_s26 + $0x20] sm:$0x33]  ;;  %vm240_vm0 = vcmask 1041408   ;;  %v466_v9 = vld [vmem:[%s172_s26 + $0x14] ss:$8 sps:$4 sm:$0xff]  }
  0x1d   : > { %279 = vmatprep.mubr.bf16.mxu0 %v509_v5  ;;  %v429_v7 = vcombine.high %v205_v6, %v205_v6  ;;  %v428_v8 = vcombine.low %v205_v6, %v205_v6  ;;  %v468_v11 = vld [vmem:[%s172_s26 + $0x10] ss:$8 sps:$4 sm:$0xff]   ;;  %v469_v12 = vld [vmem:[%s172_s26 + $0x4] ss:$8 sps:$4 sm:$0xff]   ;;  %v471_v13 = vld [vmem:[%s172_s26] ss:$8 sps:$4 sm:$0xff]  }
  0x1e   : > { %v472_v14 = vld [vmem:[%s581_s1] sm:$0xff]   ;;  %vm236_vm1 = vcmask 293888   ;;  %s587_s29 = smov (!%p193_p8, %s421_s29), 3 }
  0x1f   : > { %430 = vmatprep.subr.msk.bf16.mxu0 %vm240_vm0, %v429_v7  ;;  %v242_v10 = vsel %vm240_vm0, %v428_v8, 0  ;;  %s422_s30 = sshll.u32 %s587_s29, 3 }
  0x20   : > { %258 = vmatpush1.bf16.msra.mxu0 %v242_v10  ;;  %s196_s5 = scalar_lea.vmem %s582_s2, %s422_s30 }
  0x21   : > { %259 = vmatprep.subr.bf16.mxu0 %v466_v9 }
  0x24   : > { %260 = vmatpush1.bf16.msra.mxu0 %v468_v11 }
  0x25   : > { %261 = vmatprep.subr.bf16.mxu0 %v469_v12 }
  0x28   : > { %262 = vmatpush1.bf16.msra.mxu0 %v471_v13 }
  0x2b   : > { %431 = vmatmul.mubr.msk.bf16.vlgmr.msra.gmra.mxu0 %vm236_vm1, %v472_v14 }
  0xeb   : > { %v281_v15 = vpop.f32.mrf.mxu0 }
  0xec   : > { %v304_v20 = vmul.f32 %v281_v15, %v281_v15 }
  0xed   : > { %v283_v16 = vpop.f32.mrf.mxu0 }
  0xee   : > { %v298_v17 = vadd.f32 %v283_v16, %v281_v15  ;;  %v305_v18 = vmul.f32 %v283_v16, %v283_v16 }
  0xef   : > { %v285_v19 = vpop.f32.mrf.mxu0 }
  0xf0   : > { %299 = vadd.xlane.f32.xlu1 %v298_v17  ;;  %v308_v23 = vadd.f32 %v305_v18, %v304_v20  ;;  %v306_v25 = vmul.f32 %v285_v19, %v285_v19 }
  0xf1   : > { %v287_v21 = vpop.f32.mrf.mxu0 }
  0xf2   : > { %v307_v22 = vmul.f32 %v287_v21, %v287_v21  ;;  %v301_v24 = vadd.f32 %v287_v21, %v285_v19 }
  0xf4   : > { %309 = vadd.xlane.f32.xlu1 %v308_v23  ;;  %302 = vadd.xlane.f32.xlu0 %v301_v24  ;;  %v311_v26 = vadd.f32 %v307_v22, %v306_v25 }
  0xf8   : > { %312 = vadd.xlane.f32.xlu0 %v311_v26 }
 0x179   : > { %v300_v35 = vpop.xlane.xlu1 %299 }
 0x17a   : > { %v314_v37 = vmul.f32 0.00390625, %v300_v35 }
 0x17c   : > { %v318_v44 = vmul.f32 %v314_v37, %v314_v37  ;;  %v324_v55 = vsub.f32 %v281_v15, %v314_v37  ;;  %v325_v56 = vsub.f32 %v283_v16, %v314_v37 }
 0x17d   : > { %v303_v27 = vpop.xlane.xlu0 %302  ;;  %v310_v36 = vpop.xlane.xlu1 %309 }
 0x17e   : > { %v315_v28 = vmul.f32 0.00390625, %v303_v27  ;;  %v316_v41 = vmul.f32 0.00390625, %v310_v36 }
 0x180   : > { %v319_v30 = vmul.f32 %v315_v28, %v315_v28  ;;  %v326_v38 = vsub.f32 %v285_v19, %v315_v28  ;;  %v327_v39 = vsub.f32 %v287_v21, %v315_v28  ;;  %v320_v47 = vsub.f32 %v316_v41, %v318_v44 }
 0x181   : > { %v313_v29 = vpop.xlane.xlu0 %312 }
 0x182   : > { %v317_v31 = vmul.f32 0.00390625, %v313_v29  ;;  %v322_v48 = vmax.f32 %v320_v47, 0.0 }
 0x184   : > { %v321_v32 = vsub.f32 %v317_v31, %v319_v30  ;;  %v328_v49 = vadd.f32 1e-05, %v322_v48 }
 0x186   : > { %v323_v33 = vmax.f32 %v321_v32, 0.0 }
 0x188   : > { %v329_v34 = vadd.f32 1e-05, %v323_v33 }
 0x18a   : > { %473 = vrsqrt.f32 %v329_v34 }
 0x197   : > { %v474_v40 = vpop.eup %473 }
 0x198   : > { %v334_v42 = vmul.f32 %v474_v40, %v326_v38  ;;  %v335_v43 = vmul.f32 %v474_v40, %v327_v39 }
 0x19a   : > { %v432_v45 = vmul.f32 -1.442695, %v334_v42  ;;  %v433_v46 = vmul.f32 -1.442695, %v335_v43 }
 0x19c   : > { %475 = vpow2.f32 %v432_v45 }
 0x19d   : > { %477 = vpow2.f32 %v433_v46 }
 0x19e   : > { %479 = vrsqrt.f32 %v328_v49 }
 0x1a9   : > { %v476_v50 = vpop.eup %475 }
 0x1aa   : > { %v478_v51 = vpop.eup %477  ;;  %v342_v52 = vadd.f32 1.0, %v476_v50 }
 0x1ab   : > { %v343_v53 = vadd.f32 1.0, %v478_v51  ;;  %v480_v54 = vpop.eup %479 }
 0x1ac   : > { %481 = vrcp.f32 %v342_v52  ;;  %v332_v57 = vmul.f32 %v480_v54, %v324_v55  ;;  %v333_v59 = vmul.f32 %v480_v54, %v325_v56 }
 0x1ad   : > { %483 = vrcp.f32 %v343_v53 }
 0x1b9   : > { %v482_v58 = vpop.eup %481 }
 0x1ba   : > { %v484_v60 = vpop.eup %483  ;;  %v348_v61 = vmul.f32 %v482_v58, %v332_v57 }
 0x1bb   : > { %v349_v62 = vmul.f32 %v484_v60, %v333_v59 }
 0x1bc   : > { %350 = vst [vmem:[%s196_s5] sm:$0xff] %v348_v61 }
 0x1bd   : > { %351 = vst [vmem:[%s196_s5 + $0x8] sm:$0xff] %v349_v62 }
 0x1be PF: > { %p9_p9 = scmp.ge.s32.totalorder %s542_s13, 4   ;;  %s583_s9 = smov %s503_s10 }
 0x1bf   : > { %s584_s10 = smov %s551_s16  ;;  %s585_s11 = smov %s542_s13 }
 0x1c0   :  { %11 = sbr.rel (!%p9_p9) target bundleno = 2 (0x2), region = 101 }

</bundles_post_ra>
